<compile_context>
chip_gen: v5e
topology: v5e:2x2
jax: 0.10.0
libtpu: 0.0.40
codegen_flags: <defaults>
</compile_context>

<pallas_src>
import jax
import jax.numpy as jnp
from jax import lax
from jax.experimental import pallas as pl
from jax.experimental.pallas import tpu as pltpu

EPS = 1e-6


def _laurel_kernel(x_ref, wd_ref, wu_ref, g_ref, o_ref):
    # x_ref:  (tm, D)   row-tile of the input, native dtype
    # wd_ref: (D, Bn)   down_proj weight, canonical (K, N) layout
    # wu_ref: (Bn, D)   up_proj weight, canonical (K, N) layout
    # g_ref:  (1, D)    norm scale, cast to x dtype in the wrapper
    x = x_ref[...]                                        # native dtype into MXU

    # down_proj: (tm, D) @ (D, Bn) -> (tm, Bn), f32 accumulation.
    h = jnp.dot(x, wd_ref[...], preferred_element_type=jnp.float32)
    # up_proj:   (tm, Bn) @ (Bn, D) -> (tm, D), f32 accumulation.
    y = jnp.dot(h.astype(wu_ref.dtype), wu_ref[...],
                preferred_element_type=jnp.float32)

    # RMS-style norm:  y / max(sqrt(mean(y^2)), eps) * gamma
    #   == y * rsqrt(max(mean(y^2), eps^2)) * gamma   (exact, monotone rewrite)
    # Statistics in f32 (VPU + EUP); scale + residual in the input dtype so the
    # epilogue is bf16-native on v6e/v7x and plain f32 when x is f32.
    mean_sq = jnp.mean(y * y, axis=-1, keepdims=True)
    inv_rms = lax.rsqrt(jnp.maximum(mean_sq, EPS * EPS))
    normed = (y * inv_rms).astype(x.dtype) * g_ref[...]
    o_ref[...] = (x + normed).astype(o_ref.dtype)


def _round_up(n, m):
    return ((n + m - 1) // m) * m


def _default_tiling():
    """(tile_rows, vmem_limit_bytes) per TPU generation."""
    try:
        kind = jax.devices()[0].device_kind.lower()
    except Exception:
        kind = ""
    if "v7" in kind:
        # v7x: 64 MiB VMEM per TensorCore -> stay disciplined on the budget.
        return 512, 48 * 1024 * 1024
    # v5e / v6e: 128 MiB VMEM, HBM-bound kernel -> bigger tiles amortize the
    # ~0.35 us per-grid-step overhead and push HBM utilization.
    return 1024, 100 * 1024 * 1024


def laurel_block(x, w_down, w_up, gamma, *, tile_rows=None, vmem_limit_bytes=None):
    """LaurelBlock forward: x + norm(up_proj(down_proj(x))).

    x:       (..., D)
    w_down:  (Bn, D)   torch nn.Linear(dim, bottleneck, bias=False).weight
    w_up:    (D, Bn)   torch nn.Linear(bottleneck, dim, bias=False).weight
    gamma:   (D,)      LayerNorm weight
    """
    orig_shape = x.shape
    D = orig_shape[-1]
    Bn = w_down.shape[0]

    default_tm, default_vmem = _default_tiling()
    if tile_rows is None:
        tile_rows = default_tm
    if vmem_limit_bytes is None:
        vmem_limit_bytes = default_vmem

    x2d = x.reshape(-1, D)
    M = x2d.shape[0]

    # Row tile: multiple of 8 (sublane), clamped for small inputs.  If a single
    # tile would cover a non-trivial problem, split in two so v7x's second
    # TensorCore gets work (the row axis is marked "parallel").
    tm = min(tile_rows, _round_up(M, 8))
    if M >= 256 and pl.cdiv(M, tm) == 1:
        tm = _round_up(pl.cdiv(M, 2), 8)
    grid = (pl.cdiv(M, tm),)

    # One-time wrapper transposes: canonical (K, N) layout for both weights so
    # the MXU contracts on the RHS leading dim (no per-tile re-layout of the
    # resident weights inside the kernel).  ~256 KiB constants; constant-folds
    # under jit.
    wd_kn = w_down.T                       # (D, Bn)
    wu_kn = w_up.T                         # (Bn, D)
    g2d = gamma.astype(x.dtype).reshape(1, D)

    out = pl.pallas_call(
        _laurel_kernel,
        out_shape=jax.ShapeDtypeStruct((M, D), x.dtype),
        grid_spec=pltpu.PrefetchScalarGridSpec(
            num_scalar_prefetch=0,
            grid=grid,
            in_specs=[
                pl.BlockSpec((tm, D), lambda i: (i, 0)),     # x row-tile
                pl.BlockSpec((D, Bn), lambda i: (0, 0)),     # Wd (resident)
                pl.BlockSpec((Bn, D), lambda i: (0, 0)),     # Wu (resident)
                pl.BlockSpec((1, D), lambda i: (0, 0)),      # gamma (resident)
            ],
            out_specs=pl.BlockSpec((tm, D), lambda i: (i, 0)),
        ),
        compiler_params=pltpu.CompilerParams(
            dimension_semantics=("parallel",),
            vmem_limit_bytes=vmem_limit_bytes,
        ),
    )(x2d, wd_kn, wu_kn, g2d)

    return out.reshape(orig_shape)


def laurel_block_ref(x, w_down, w_up, gamma):
    """Pure-JAX reference matching the PyTorch module semantics."""
    y = x @ w_down.T          # down_proj
    y = y @ w_up.T            # up_proj
    mean_sq = jnp.mean(y * y, axis=-1, keepdims=True)
    rms = jnp.maximum(jnp.sqrt(mean_sq), EPS)
    y = y / rms * gamma
    return x + y


if __name__ == "__main__":
    key = jax.random.PRNGKey(0)
    k_x, k_d, k_u, k_x2 = jax.random.split(key, 4)

    # Small lane-dense demo shapes (D multiple of 128; bottleneck = module default).
    batch, seq, dim = 2, 8, 128
    bottleneck = 64

    x = jax.random.normal(k_x, (batch, seq, dim), dtype=jnp.float32)
    # torch nn.Linear(dim, bottleneck, bias=False).weight -> (bottleneck, dim)
    w_down = jax.random.normal(k_d, (bottleneck, dim), dtype=jnp.float32) * 0.05
    # torch nn.Linear(bottleneck, dim, bias=False).weight -> (dim, bottleneck)
    w_up = jax.random.normal(k_u, (dim, bottleneck), dtype=jnp.float32) * 0.05
    gamma = jnp.ones((dim,), dtype=jnp.float32)  # LayerNorm weight init = ones

    out = jax.block_until_ready(laurel_block(x, w_down, w_up, gamma))
    ref = laurel_block_ref(x, w_down, w_up, gamma)
    assert out.shape == x.shape
    assert jnp.allclose(out, ref, atol=1e-4, rtol=1e-4), "mismatch vs reference"

    # Ragged row count (M not a multiple of the tile) exercises the no-pad path.
    x_ragged = jax.random.normal(k_x2, (3, 7, dim), dtype=jnp.float32)
    out_r = jax.block_until_ready(laurel_block(x_ragged, w_down, w_up, gamma))
    ref_r = laurel_block_ref(x_ragged, w_down, w_up, gamma)
    assert out_r.shape == x_ragged.shape
    assert jnp.allclose(out_r, ref_r, atol=1e-4, rtol=1e-4), "ragged mismatch"

    print("KERNEL_OK")
</pallas_src>

<mosaic_0001>
module attributes {stable_mosaic.version = 11 : i64} {
  func.func @_laurel_kernel(%arg0: i32, %arg1: memref<16x128xf32, #tpu.memory_space<vmem>>, %arg2: memref<128x64xf32, #tpu.memory_space<vmem>>, %arg3: memref<64x128xf32, #tpu.memory_space<vmem>>, %arg4: memref<1x128xf32, #tpu.memory_space<vmem>>, %arg5: memref<16x128xf32, #tpu.memory_space<vmem>>) attributes {dimension_semantics = [#tpu.dimension_semantics<parallel>], iteration_bounds = array<i64: 1>, scalar_prefetch = 0 : i64, scratch_operands = 0 : i64, tpu.core_type = #tpu.core_type<tc>, window_params = [{transform_indices = @transform_0, window_bounds = array<i64: 16, 128>}, {pipeline_mode = #tpu.pipeline_mode<synchronous>, transform_indices = @transform_1, window_bounds = array<i64: 128, 64>}, {pipeline_mode = #tpu.pipeline_mode<synchronous>, transform_indices = @transform_2, window_bounds = array<i64: 64, 128>}, {pipeline_mode = #tpu.pipeline_mode<synchronous>, transform_indices = @transform_3, window_bounds = array<i64: 1, 128>}, {transform_indices = @transform_4, window_bounds = array<i64: 16, 128>}]} {
    %c0 = arith.constant 0 : index
    %c0_0 = arith.constant 0 : index
    %0 = vector.load %arg1[%c0, %c0_0] : memref<16x128xf32, #tpu.memory_space<vmem>>, vector<16x128xf32>
    %c0_1 = arith.constant 0 : index
    %c0_2 = arith.constant 0 : index
    %1 = vector.load %arg2[%c0_1, %c0_2] : memref<128x64xf32, #tpu.memory_space<vmem>>, vector<128x64xf32>
    %cst = arith.constant dense<0.000000e+00> : vector<16x64xf32>
    %2 = tpu.matmul %0, %1, %cst {dimension_numbers = #tpu.dot_dimension_numbers<[1], [0], [0], [1], [0, 0, 1, 1], [], []>} : vector<16x128xf32>, vector<128x64xf32>, vector<16x64xf32> -> vector<16x64xf32>
    %c0_3 = arith.constant 0 : index
    %c0_4 = arith.constant 0 : index
    %3 = vector.load %arg3[%c0_3, %c0_4] : memref<64x128xf32, #tpu.memory_space<vmem>>, vector<64x128xf32>
    %cst_5 = arith.constant dense<0.000000e+00> : vector<16x128xf32>
    %4 = tpu.matmul %2, %3, %cst_5 {dimension_numbers = #tpu.dot_dimension_numbers<[1], [0], [0], [1], [0, 0, 1, 1], [], []>} : vector<16x64xf32>, vector<64x128xf32>, vector<16x128xf32> -> vector<16x128xf32>
    %5 = arith.mulf %4, %4 : vector<16x128xf32>
    %cst_6 = arith.constant dense<0.000000e+00> : vector<16xf32>
    %6 = vector.multi_reduction <add>, %5, %cst_6 [1] : vector<16x128xf32> to vector<16xf32>
    %7 = vector.shape_cast %6 : vector<16xf32> to vector<16x1xf32>
    %cst_7 = arith.constant 1.280000e+02 : f32
    %8 = vector.broadcast %cst_7 : f32 to vector<16x1xf32>
    %9 = arith.divf %7, %8 : vector<16x1xf32>
    %cst_8 = arith.constant 9.99999996E-13 : f32
    %10 = vector.broadcast %cst_8 : f32 to vector<16x1xf32>
    %11 = arith.maximumf %9, %10 : vector<16x1xf32>
    %12 = math.rsqrt %11 : vector<16x1xf32>
    %13 = vector.broadcast %12 : vector<16x1xf32> to vector<16x128xf32>
    %14 = arith.mulf %4, %13 : vector<16x128xf32>
    %c0_9 = arith.constant 0 : index
    %c0_10 = arith.constant 0 : index
    %15 = vector.load %arg4[%c0_9, %c0_10] : memref<1x128xf32, #tpu.memory_space<vmem>>, vector<1x128xf32>
    %16 = vector.broadcast %15 : vector<1x128xf32> to vector<16x128xf32>
    %17 = arith.mulf %14, %16 : vector<16x128xf32>
    %18 = arith.addf %0, %17 : vector<16x128xf32>
    %c0_11 = arith.constant 0 : index
    %c0_12 = arith.constant 0 : index
    %19 = vector.load %arg5[%c0_11, %c0_12] : memref<16x128xf32, #tpu.memory_space<vmem>>, vector<16x128xf32>
    tpu.vector_store %arg5[%c0_11, %c0_12], %18 {strides = array<i32>} : memref<16x128xf32, #tpu.memory_space<vmem>>, vector<16x128xf32>,
    return
  }
  func.func @transform_0(%arg0: i32) -> (i32, i32) {
    %c0_i32 = arith.constant 0 : i32
    %c0_i32_0 = arith.constant 0 : i32
    return %arg0, %c0_i32 : i32, i32
  }
  func.func @transform_1(%arg0: i32) -> (i32, i32) {
    %c0_i32 = arith.constant 0 : i32
    %c0_i32_0 = arith.constant 0 : i32
    %c0_i32_1 = arith.constant 0 : i32
    return %c0_i32, %c0_i32_0 : i32, i32
  }
  func.func @transform_2(%arg0: i32) -> (i32, i32) {
    %c0_i32 = arith.constant 0 : i32
    %c0_i32_0 = arith.constant 0 : i32
    %c0_i32_1 = arith.constant 0 : i32
    return %c0_i32, %c0_i32_0 : i32, i32
  }
  func.func @transform_3(%arg0: i32) -> (i32, i32) {
    %c0_i32 = arith.constant 0 : i32
    %c0_i32_0 = arith.constant 0 : i32
    %c0_i32_1 = arith.constant 0 : i32
    return %c0_i32, %c0_i32_0 : i32, i32
  }
  func.func @transform_4(%arg0: i32) -> (i32, i32) {
    %c0_i32 = arith.constant 0 : i32
    %c0_i32_0 = arith.constant 0 : i32
    return %arg0, %c0_i32 : i32, i32
  }
}

</mosaic_0001>

<bundles_post_ra>
// kernel: tpu_custom_call.1
= control target key start
LH: loop header
LB: loop body
LE: loop exit
PB: predicated region body
PF: predicated region fallthrough
CT: control target
= control target key end

     0   :  { %s336_s0 = inlined_call_operand.vmem [shape: f32[16,128], index: 0, kind: input, shape index: {}]   ;;  %s337_s1 = inlined_call_operand.vmem [shape: f32[128,64], index: 1, kind: input, shape index: {}]   ;;  %s338_s2 = inlined_call_operand.vmem [shape: f32[64,128], index: 2, kind: input, shape index: {}]   ;;  %s339_s3 = inlined_call_operand.vmem [shape: f32[1,128], index: 3, kind: input, shape index: {}]   ;;  %s340_s4 = inlined_call_operand.hbm [shape: f32[16,128], index: 4, kind: output, shape index: {}]  }
   0x1   :  { %v35_v0 = vld [vmem:[%s337_s1 + $0x78] sm:$0xff]  ;;  %v34_v1 = vld [vmem:[%s337_s1 + $0x70] sm:$0xff]  ;;  %v33_v2 = vld [vmem:[%s337_s1 + $0x68] sm:$0xff] }
   0x2   :  { %36 = vmatpush.msra.mxu0 %v35_v0  ;;  %166 = vmatpush.msra.mxu2 %v35_v0  ;;  %v32_v3 = vld [vmem:[%s337_s1 + $0x60] sm:$0xff]  ;;  %v31_v4 = vld [vmem:[%s337_s1 + $0x58] sm:$0xff]  ;;  %v65_v6 = vld [vmem:[%s338_s2 + $0x30] sm:$0xff] }
   0x3   :  { %v66_v5 = vld [vmem:[%s338_s2 + $0x38] sm:$0xff]  ;;  %v30_v7 = vld [vmem:[%s337_s1 + $0x50] sm:$0xff] }
   0x4   :  { %37 = vmatpush.msra.mxu0 %v34_v1  ;;  %167 = vmatpush.msra.mxu2 %v34_v1 }
   0x5   :  { %82 = vmatpush.msra.mxu1 %v66_v5 }
   0x6   :  { %38 = vmatpush.msra.mxu0 %v33_v2  ;;  %168 = vmatpush.msra.mxu2 %v33_v2 }
   0x8   :  { %39 = vmatpush.msra.mxu0 %v32_v3  ;;  %169 = vmatpush.msra.mxu2 %v32_v3 }
   0x9   :  { %9 = vsyncpa [#allocation3], 0  ;;  %v64_v8 = vld [vmem:[%s338_s2 + $0x28] sm:$0xff]  ;;  %83 = vmatpush.msra.mxu1 %v65_v6  ;;  %v63_v10 = vld [vmem:[%s338_s2 + $0x20] sm:$0xff]  ;;  %vm67_vm0 = vcmask 523264   ;;  %v219_v32 = vmov 128.0  }
   0xa   :  { %40 = vmatpush.msra.mxu0 %v31_v4  ;;  %170 = vmatpush.msra.mxu2 %v31_v4  ;;  %v29_v9 = vld [vmem:[%s337_s1 + $0x48] sm:$0xff]  ;;  %v28_v11 = vld [vmem:[%s337_s1 + $0x40] sm:$0xff]  ;;  %v62_v12 = vld [vmem:[%s338_s2 + $0x18] sm:$0xff]  ;;  %187 = vrcp.f32 %v219_v32  ;;  %s221_s18 = smov 128   ;;  %s222_s19 = smov 8  }
   0xb   :  { %84 = vmatpush.msra.mxu1 %v64_v8  ;;  %v27_v13 = vld [vmem:[%s337_s1 + $0x38] sm:$0xff]  ;;  %v61_v14 = vld [vmem:[%s338_s2 + $0x10] sm:$0xff]  ;;  %v60_v16 = vld [vmem:[%s338_s2 + $0x8] sm:$0xff] }
   0xc   :  { %41 = vmatpush.msra.mxu0 %v30_v7  ;;  %171 = vmatpush.msra.mxu2 %v30_v7  ;;  %v26_v15 = vld [vmem:[%s337_s1 + $0x30] sm:$0xff]  ;;  %v25_v17 = vld [vmem:[%s337_s1 + $0x28] sm:$0xff]  ;;  %v24_v18 = vld [vmem:[%s337_s1 + $0x20] sm:$0xff] }
   0xd   :  { %85 = vmatpush.msra.mxu1 %v63_v10  ;;  %v23_v19 = vld [vmem:[%s337_s1 + $0x18] sm:$0xff]  ;;  %v22_v20 = vld [vmem:[%s337_s1 + $0x10] sm:$0xff]  ;;  %v21_v21 = vld [vmem:[%s337_s1 + $0x8] sm:$0xff] }
   0xe   :  { %42 = vmatpush.msra.mxu0 %v29_v9  ;;  %172 = vmatpush.msra.mxu2 %v29_v9  ;;  %v20_v22 = vld [vmem:[%s337_s1] sm:$0xff]  ;;  %v323_v24 = vld [vmem:[%s336_s0 + $0x8] sm:$0xff] }
   0xf   :  { %86 = vmatpush.msra.mxu1 %v62_v12  ;;  %v18_v23 = vld [vmem:[%s336_s0] sm:$0xff] }
  0x10   :  { %43 = vmatpush.msra.mxu0 %v28_v11  ;;  %173 = vmatpush.msra.mxu2 %v28_v11  ;;  %v59_v25 = vld [vmem:[%s338_s2] sm:$0xff]  ;;  %v188_v33 = vpop.eup %187  ;;  %s220_s2 = smov [#allocation2]  }
  0x11   :  { %87 = vmatpush.msra.mxu1 %v61_v14  ;;  %v104_v34 = vmul.f32 128.0, %v188_v33  ;;  %vm108_vm1 = vweird.f32 %v188_v33  ;;  %v186_v53 = vld [vmem:[%s339_s3] ss:$0 sm:$0xff]  ;;  %s150_s15 = sshll.u32 %s220_s2, 4  ;;  %s152_s3 = sshll.u32 %s340_s4, 4  ;;  %s151_s15 = int_to_ptr.vmem [resolvable:$true] %s150_s15  ;;  %s153_s3 = int_to_ptr.hbm [resolvable:$true] %s152_s3 }
  0x12   :  { %44 = vmatpush.msra.mxu0 %v27_v13  ;;  %174 = vmatpush.msra.mxu2 %v27_v13 }
  0x13   :  { %88 = vmatpush.msra.mxu1 %v60_v16  ;;  %v105_v35 = vsub.f32 1.0, %v104_v34 }
  0x14   :  { %45 = vmatpush.msra.mxu0 %v26_v15  ;;  %175 = vmatpush.msra.mxu2 %v26_v15 }
  0x15   :  { %89 = vmatpush.msra.mxu1 %v59_v25  ;;  %v106_v36 = vmul.f32 %v188_v33, %v105_v35 }
  0x16   :  { %46 = vmatpush.msra.mxu0 %v25_v17  ;;  %176 = vmatpush.msra.mxu2 %v25_v17 }
  0x17   :  { %v107_v37 = vadd.f32 %v188_v33, %v106_v36 }
  0x18   :  { %47 = vmatpush.msra.mxu0 %v24_v18  ;;  %177 = vmatpush.msra.mxu2 %v24_v18 }
  0x19   :  { %v109_v38 = vsel %vm108_vm1, %v188_v33, %v107_v37 }
  0x1a   :  { %48 = vmatpush.msra.mxu0 %v23_v19  ;;  %178 = vmatpush.msra.mxu2 %v23_v19 }
  0x1c   :  { %49 = vmatpush.msra.mxu0 %v22_v20  ;;  %179 = vmatpush.msra.mxu2 %v22_v20 }
  0x1e   :  { %50 = vmatpush.msra.mxu0 %v21_v21  ;;  %180 = vmatpush.msra.mxu2 %v21_v21 }
  0x20   :  { %51 = vmatpush.msra.mxu0 %v20_v22  ;;  %181 = vmatpush.msra.mxu2 %v20_v22 }
  0x21   :  { %52 = vmatmul.f32.vlgmr.msra.gmra.mxu0 %v18_v23  ;;  %55 = vmatmul.f32.vlgmr.msra.gmra.mxu2 %v323_v24 }
  0x9e   :  { %v53_v26 = vpop.f32.mrf.mxu0 }
  0x9f   :  { %164 = vmatmul.msk.f32.vlgmr.msra.gmra.mxu1 %vm67_vm0, %v53_v26 }
  0xa4   :  { %v56_v27 = vpop.f32.mrf.mxu2 }
  0xa7   :  { %165 = vmatmul.msk.f32.gmra.mxu1 %vm67_vm0, %v56_v27 }
 0x11c   :  { %v91_v28 = vpop.f32.mrf.mxu1 }
 0x11d   :  { %v97_v29 = vmul.f32 %v91_v28, %v91_v28 }
 0x11f   :  { %99 = vadd.xlane.f32.xlu0 %v97_v29 }
 0x124   :  { %v94_v30 = vpop.f32.mrf.mxu1 }
 0x125   :  { %v98_v31 = vmul.f32 %v94_v30, %v94_v30 }
 0x127   :  { %101 = vadd.xlane.f32.xlu0 %v98_v31 }
 0x192   :  { %v100_v39 = vpop.xlane.xlu0 %99 }
 0x193   :  { %v110_v40 = vmul.f32 %v109_v38, %v100_v39 }
 0x195   :  { %v112_v41 = vmax.f32 %v110_v40, 1e-12 }
 0x197   :  { %189 = vrsqrt.f32 %v112_v41  ;;  %vm120_vm3 = vweird.f32 %v112_v41 }
 0x19a   :  { %v102_v42 = vpop.xlane.xlu0 %101 }
 0x19b   :  { %v111_v43 = vmul.f32 %v109_v38, %v102_v42 }
 0x19d   :  { %v190_v44 = vpop.eup %189  ;;  %v113_v45 = vmax.f32 %v111_v43, 1e-12 }
 0x19e   :  { %v115_v46 = vmul.f32 %v190_v44, %v112_v41  ;;  %vm121_vm2 = vweird.f32 %v190_v44 }
 0x19f   :  { %191 = vrsqrt.f32 %v113_v45  ;;  %vm122_vm4 = vmor %vm120_vm3, %vm121_vm2  ;;  %vm130_vm6 = vweird.f32 %v113_v45 }
 0x1a0   :  { %v116_v47 = vmul.f32 %v190_v44, %v115_v46 }
 0x1a2   :  { %v117_v48 = vmul.f32 0.5, %v116_v47 }
 0x1a4   :  { %v118_v49 = vsub.f32 1.5, %v117_v48 }
 0x1a5   :  { %v192_v50 = vpop.eup %191 }
 0x1a6   :  { %v119_v51 = vmul.f32 %v190_v44, %v118_v49  ;;  %v125_v52 = vmul.f32 %v192_v50, %v113_v45  ;;  %vm131_vm5 = vweird.f32 %v192_v50 }
 0x1a7   :  { %vm132_vm7 = vmor %vm130_vm6, %vm131_vm5 }
 0x1a8   :  { %v123_v54 = vsel %vm122_vm4, %v190_v44, %v119_v51  ;;  %v126_v55 = vmul.f32 %v192_v50, %v125_v52 }
 0x1a9   :  { %v134_v56 = vmul.f32 %v123_v54, %v91_v28 }
 0x1aa   :  { %v127_v57 = vmul.f32 0.5, %v126_v55 }
 0x1ab   :  { %v140_v58 = vmul.f32 %v186_v53, %v134_v56 }
 0x1ac   :  { %v128_v59 = vsub.f32 1.5, %v127_v57 }
 0x1ad   :  { %v142_v60 = vadd.f32 %v140_v58, %v18_v23 }
 0x1ae   :  { %v129_v61 = vmul.f32 %v192_v50, %v128_v59 }
 0x1af   :  { %144 = vst [vmem:[#allocation2] sm:$0xff] %v142_v60 }
 0x1b0   :  { %v133_v62 = vsel %vm132_vm7, %v192_v50, %v129_v61 }
 0x1b1   :  { %v135_v63 = vmul.f32 %v133_v62, %v94_v30 }
 0x1b3   :  { %v141_v0 = vmul.f32 %v186_v53, %v135_v63 }
 0x1b5   :  { %v143_v1 = vadd.f32 %v141_v0, %v323_v24 }
 0x1b7   :  { %145 = vst [vmem:[#allocation2 + $0x8] sm:$0xff] %v143_v1 }
 0x1b8   :  { %158 = dma.vmem_to_hbm [thread:$0]  %s151_s15, 256, %s153_s3, [#allocation3], %s221_s18, %s221_s18, %s222_s19  }
 0x1b9   :  { %217 = dma.done.wait [#allocation3], 256  }
 0x1ba   :  { %218 = vsyncadd [#allocation3], 4294967040 }
 0x1bb   :  { %163 = vsyncpa [#allocation3], 1 }

</bundles_post_ra>
